<compile_context>
chip_gen: v7x
topology: tpu7x:2x2x1
jax: 0.10.0
libtpu: 0.0.40
codegen_flags: <defaults>
</compile_context>

<pallas_src>
import functools
import math

import jax
import jax.numpy as jnp
from jax.experimental import pallas as pl
from jax.experimental.pallas import tpu as pltpu


def _shortcut_kernel(x_ref, s_ref, o_ref, *, rows_pad, rows_data):
    """One grid step processes Bt whole images.

    x_ref : (Bt, C*Ho/G,    G*2W)   grouped NCHW rows (odd-H rows ride along, selected out)
    s_ref : (G*2W, G*Wo)            block-diagonal 0/1 selection (one-hot columns)
    o_ref : (Bt, Cout*Ho/G, G*Wo)   grouped NCHW output rows (channel-padded)
    """
    bt, rows_out, lanes_out = o_ref.shape

    # Zero only the padded-channel row groups; data rows are fully overwritten below.
    if rows_pad > 0:
        o_ref[:, :rows_pad, :] = jnp.zeros((bt, rows_pad, lanes_out), o_ref.dtype)
    tail = rows_out - rows_pad - rows_data
    if tail > 0:
        o_ref[:, rows_pad + rows_data:, :] = jnp.zeros((bt, tail, lanes_out), o_ref.dtype)

    sel = s_ref[...]  # hoisted: loop-invariant load

    def body(b, carry):
        # One small 2D matmul per image: every column of `sel` is one-hot, so each output
        # element is exactly x * 1.0 (exact in any float dtype, incl. the f32/bf16x3 path).
        y = jnp.dot(x_ref[b], sel, preferred_element_type=jnp.float32)
        o_ref[b, rows_pad:rows_pad + rows_data, :] = y.astype(o_ref.dtype)
        return carry

    jax.lax.fori_loop(0, bt, body, 0)


def _pick_group(Ho, Wo, W, pad, C):
    """Row-group factor G: G | pad*Ho and G | C*Ho (so channel-pad boundaries land on
    whole group rows), preferring the smallest G that makes the output lane dim G*Wo a
    multiple of 128 while keeping the matmul depth K = G*2W small."""
    if Wo >= 128:
        return 1
    D = Ho * math.gcd(pad, C)           # every divisor of D divides pad*Ho, C*Ho, Cout*Ho
    divisors = [g for g in range(1, D + 1) if D % g == 0]
    good = [g for g in divisors if (g * Wo) % 128 == 0 and g * 2 * W <= 1024]
    if good:
        return min(good)
    ok = [g for g in divisors if g * 2 * W <= max(2 * W, 512)]
    return max(ok) if ok else 1


def _round_up(v, m):
    return (v + m - 1) // m * m


def _pick_batch_tile(B, rows_in, lanes_in, rows_out, lanes_out, sel_shape,
                     itemsize, budget):
    """Largest batch tile whose double-buffered, tile-padded blocks fit the VMEM budget.
    No divisibility requirement on B; capped at ceil(B/2) so v7x gets >= 2 parallel steps."""
    sub = 8 * max(1, 4 // itemsize)     # sublane tile: 8 (f32) / 16 (bf16) / 32 (int8)

    def tile_bytes(r, l):
        return _round_up(max(r, 1), sub) * _round_up(max(l, 1), 128) * itemsize

    per_img = 2 * (tile_bytes(rows_in, lanes_in) + tile_bytes(rows_out, lanes_out))
    sel_bytes = 2 * tile_bytes(*sel_shape)          # constant block, still double-buffered
    avail = max(budget - sel_bytes, per_img)
    bt = max(1, avail // per_img)
    bt = min(bt, B)
    if B >= 2:
        bt = min(bt, -(-B // 2))        # >= 2 grid steps -> both v7x TensorCores busy
    return int(bt)


def lambda_layer_shortcut(x, planes):
    """Pallas equivalent of the ResNet option-A LambdaLayer shortcut (NCHW)."""
    B, C, H, W = x.shape
    Ho, Wo = (H + 1) // 2, (W + 1) // 2          # matches x[:, :, ::2, ::2]
    pad = planes // 4
    Cout = C + 2 * pad

    if H % 2:                                    # make the (Ho, 2W) row reshape free
        x = jnp.pad(x, ((0, 0), (0, 0), (0, 1), (0, 0)))
        H = H + 1

    G = _pick_group(Ho, Wo, W, pad, C)
    rows_in, lanes_in = (C * Ho) // G, G * 2 * W
    rows_out, lanes_out = (Cout * Ho) // G, G * Wo
    rows_pad = (pad * Ho) // G

    # Block-diagonal one-hot selection: S[j*2W + 2*wo, j*Wo + wo] = 1 (j < G, wo < Wo).
    # Carries x.dtype so bf16 inputs stay on the native MXU path; selection is exact.
    j = jnp.arange(G)[:, None]
    wo = jnp.arange(Wo)[None, :]
    rows_idx = (j * (2 * W) + 2 * wo).ravel()
    cols_idx = (j * Wo + wo).ravel()
    sel = jnp.zeros((lanes_in, lanes_out), x.dtype).at[rows_idx, cols_idx].set(1)

    # Generation-aware VMEM sizing (v5e/v6e: 128 MiB, v7x: 64 MiB per TensorCore).
    cap = 64 << 20
    try:
        cap = int(getattr(pltpu.get_tpu_info(), "vmem_capacity_bytes", cap))
    except Exception:
        pass
    cap = max(cap, 32 << 20)
    itemsize = x.dtype.itemsize
    Bt = _pick_batch_tile(B, rows_in, lanes_in, rows_out, lanes_out,
                          (lanes_in, lanes_out), itemsize, budget=int(cap * 0.70))
    grid = pl.cdiv(B, Bt)

    # Free metadata reshape of the contiguous NCHW array into grouped per-image rows.
    xg = x.reshape(B, rows_in, lanes_in)

    kernel = functools.partial(_shortcut_kernel, rows_pad=rows_pad, rows_data=rows_in)
    flops = 2 * B * rows_in * lanes_in * lanes_out           # tiny selection matmuls
    bytes_accessed = (B * rows_in * lanes_in + B * rows_out * lanes_out
                      + lanes_in * lanes_out) * itemsize

    out = pl.pallas_call(
        kernel,
        out_shape=jax.ShapeDtypeStruct((B, rows_out, lanes_out), x.dtype),
        grid_spec=pltpu.PrefetchScalarGridSpec(
            num_scalar_prefetch=0,
            grid=(grid,),
            in_specs=[
                pl.BlockSpec((Bt, rows_in, lanes_in), lambda i: (i, 0, 0)),
                pl.BlockSpec((lanes_in, lanes_out), lambda i: (0, 0)),   # constant: no re-DMA
            ],
            out_specs=pl.BlockSpec((Bt, rows_out, lanes_out), lambda i: (i, 0, 0)),
        ),
        compiler_params=pltpu.CompilerParams(
            dimension_semantics=("parallel",),
            vmem_limit_bytes=int(cap * 0.85)),
        cost_estimate=pl.CostEstimate(flops=flops, transcendentals=0,
                                      bytes_accessed=bytes_accessed),
    )(xg, sel)

    # Free metadata reshape back to NCHW of the downsampled spatial dims.
    return out.reshape(B, Cout, Ho, Wo)


if __name__ == "__main__":
    key = jax.random.PRNGKey(0)
    B, C, H, W = 2, 4, 16, 16
    planes = 2 * C                      # stride-2 ResNet stage doubles the planes
    x = jax.random.normal(key, (B, C, H, W), dtype=jnp.float32)

    out = lambda_layer_shortcut(x, planes)
    out = jax.block_until_ready(out)

    # Pure-JAX reference of the PyTorch lambda: F.pad(x[:, :, ::2, ::2], ...).
    pad = planes // 4
    ref = jnp.pad(x[:, :, ::2, ::2], ((0, 0), (pad, pad), (0, 0), (0, 0)))

    assert out.shape == ref.shape, (out.shape, ref.shape)
    assert bool(jnp.allclose(out, ref, atol=1e-6)), "kernel mismatch vs reference"
    print("KERNEL_OK")
</pallas_src>

<mosaic_0001>
module attributes {stable_mosaic.version = 11 : i64} {
  func.func @_shortcut_kernel(%arg0: i32, %arg1: memref<1x2x512xf32, #tpu.memory_space<vmem>>, %arg2: memref<512x128xf32, #tpu.memory_space<vmem>>, %arg3: memref<1x4x128xf32, #tpu.memory_space<vmem>>) attributes {dimension_semantics = [#tpu.dimension_semantics<parallel>], iteration_bounds = array<i64: 2>, scalar_prefetch = 0 : i64, scratch_operands = 0 : i64, tpu.core_type = #tpu.core_type<tc>, window_params = [{transform_indices = @transform_0, window_bounds = array<i64: 1, 2, 512>}, {pipeline_mode = #tpu.pipeline_mode<synchronous>, transform_indices = @transform_1, window_bounds = array<i64: 512, 128>}, {transform_indices = @transform_2, window_bounds = array<i64: 1, 4, 128>}]} {
    %cst = arith.constant 0.000000e+00 : f32
    %0 = vector.broadcast %cst : f32 to vector<1x1x128xf32>
    %c0 = arith.constant 0 : index
    %c0_0 = arith.constant 0 : index
    %c0_1 = arith.constant 0 : index
    %1 = vector.load %arg3[%c0, %c0_0, %c0_1] : memref<1x4x128xf32, #tpu.memory_space<vmem>>, vector<1x1x128xf32>
    tpu.vector_store %arg3[%c0, %c0_0, %c0_1], %0 {strides = array<i32>} : memref<1x4x128xf32, #tpu.memory_space<vmem>>, vector<1x1x128xf32>,
    %cst_2 = arith.constant 0.000000e+00 : f32
    %2 = vector.broadcast %cst_2 : f32 to vector<1x1x128xf32>
    %c0_3 = arith.constant 0 : index
    %c3 = arith.constant 3 : index
    %c0_4 = arith.constant 0 : index
    %3 = vector.load %arg3[%c0_3, %c3, %c0_4] : memref<1x4x128xf32, #tpu.memory_space<vmem>>, vector<1x1x128xf32>
    tpu.vector_store %arg3[%c0_3, %c3, %c0_4], %2 {strides = array<i32>} : memref<1x4x128xf32, #tpu.memory_space<vmem>>, vector<1x1x128xf32>,
    %c0_5 = arith.constant 0 : index
    %c0_6 = arith.constant 0 : index
    %4 = vector.load %arg2[%c0_5, %c0_6] : memref<512x128xf32, #tpu.memory_space<vmem>>, vector<512x128xf32>
    %c0_i32 = arith.constant 0 : i32
    %5 = arith.index_cast %c0_i32 : i32 to index
    %c0_7 = arith.constant 0 : index
    %c0_8 = arith.constant 0 : index
    %6 = vector.load %arg1[%5, %c0_7, %c0_8] : memref<1x2x512xf32, #tpu.memory_space<vmem>>, vector<1x2x512xf32>
    %7 = vector.shape_cast %6 : vector<1x2x512xf32> to vector<2x512xf32>
    %cst_9 = arith.constant dense<0.000000e+00> : vector<2x128xf32>
    %8 = tpu.matmul %7, %4, %cst_9 {dimension_numbers = #tpu.dot_dimension_numbers<[1], [0], [0], [1], [0, 0, 1, 1], [], []>} : vector<2x512xf32>, vector<512x128xf32>, vector<2x128xf32> -> vector<2x128xf32>
    %9 = arith.index_cast %c0_i32 : i32 to index
    %c1 = arith.constant 1 : index
    %c0_10 = arith.constant 0 : index
    %10 = vector.load %arg3[%9, %c1, %c0_10] : memref<1x4x128xf32, #tpu.memory_space<vmem>>, vector<1x2x128xf32>
    %11 = vector.shape_cast %10 : vector<1x2x128xf32> to vector<2x128xf32>
    %12 = vector.shape_cast %8 : vector<2x128xf32> to vector<1x2x128xf32>
    tpu.vector_store %arg3[%9, %c1, %c0_10], %12 {strides = array<i32>} : memref<1x4x128xf32, #tpu.memory_space<vmem>>, vector<1x2x128xf32>,
    %c1_i32 = arith.constant 1 : i32
    return
  }
  func.func @transform_0(%arg0: i32) -> (i32, i32, i32) {
    %c0_i32 = arith.constant 0 : i32
    %c0_i32_0 = arith.constant 0 : i32
    %c0_i32_1 = arith.constant 0 : i32
    return %arg0, %c0_i32, %c0_i32_0 : i32, i32, i32
  }
  func.func @transform_1(%arg0: i32) -> (i32, i32) {
    %c0_i32 = arith.constant 0 : i32
    %c0_i32_0 = arith.constant 0 : i32
    %c0_i32_1 = arith.constant 0 : i32
    return %c0_i32, %c0_i32_0 : i32, i32
  }
  func.func @transform_2(%arg0: i32) -> (i32, i32, i32) {
    %c0_i32 = arith.constant 0 : i32
    %c0_i32_0 = arith.constant 0 : i32
    %c0_i32_1 = arith.constant 0 : i32
    return %arg0, %c0_i32, %c0_i32_0 : i32, i32, i32
  }
}

</mosaic_0001>

<bundles_post_ra>
// kernel: tpu_custom_call.1
= control target key start
LH: loop header
LB: loop body
LE: loop exit
PB: predicated region body
PF: predicated region fallthrough
CT: control target
= control target key end

     0   :  { %7 = vsyncpa [#allocation3], 0  ;;  %s1063_s0 = inlined_call_operand.hbm [shape: f32[2,2,512], index: 0, kind: input, shape index: {}]   ;;  %s1064_s1 = inlined_call_operand.hbm [shape: f32[512,128], index: 1, kind: input, shape index: {}]   ;;  %s1065_s2 = inlined_call_operand.hbm [shape: f32[2,4,128], index: 2, kind: output, shape index: {}]  }
   0x1   :  { %9 = vsyncpa [#allocation3 + $0x1], 0 }
   0x2   :  { %10 = vsyncpa [#allocation6], 0 }
   0x3   :  { %11 = vsyncpa [#allocation4], 0 }
   0x4   :  { %13 = vsyncpa [#allocation4 + $0x1], 0  ;;  %s863_s9 = smov 0   ;;  %s865_s10 = smov 0  }
   0x5   :  { %s867_s11 = smov 0   ;;  %s869_s12 = smov 0  }
   0x6 LB: > { %s884_s13 = sadd.s32 4294967295, %s839_s12   ;;  %s499_s14 = sadd.s32 4294967294, %s839_s12   ;;  %s839_s12 = sphi %s869_s12, %s1085_s12   ;;  %s835_s11 = sphi %s867_s11, %s1084_s11   ;;  %s831_s10 = sphi %s865_s10, %s1083_s10   ;;  %s827_s9 = sphi %s863_s9, %s1082_s9  }
   0x7   : > { %p39_p0 = scmp.ne.s32.totalorder %s831_s10, %s827_s9  ;;  %p1066_p1 = scmp.eq.s32.totalorder %s884_s13, 0 }
   0x8   : > { %p90_p3 = scmp.eq.s32.totalorder %s499_s14, 1  ;;  %p500_p5 = scmp.ge.s32.totalorder %s839_s12, 1 }
   0x9   : > { %p893_p4 = por %p1066_p1, %p39_p0  ;;  %p97_p7 = scmp.lt.s32.totalorder %s839_s12, 3 }
   0xa   : > { %p898_p6 = por %p90_p3, %p39_p0  ;;  %s841_s18 = smov [#allocation5]  }
   0xb   : > { %s1069_s15 = scalar_select %p893_p4, 1, 0 }
   0xc   : > { %s1070_s16 = scalar_select %p898_p6, 1, 0 }
   0xd   : > { %p903_p8 = pnand %p500_p5, %p97_p7  ;;  %s109_s19 = sshll.u32 %s841_s18, 4  ;;  %s907_s19 = int_to_ptr.vmem [resolvable:$true] %s109_s19 }
   0xe   : > { %s919_s21 = sadd.s32 1, %s839_s12   ;;  %s26_s22 = sadd.s32 1, %s835_s11 }
   0xf   : > { %s1071_s17 = scalar_select %p903_p8, 1, 0 }
  0x10   : > { %p657_p9 = pneg %p903_p8  ;;  %s23_s23 = ssub.s32 %s839_s12, %s919_s21 }
  0x11   : > { %s711_s26 = scalar_lea.hbm %s1064_s1, 8192 }
  0x12   : > { %p914_p11 = pnand %p657_p9, %p1066_p1  ;;  %p712_p12 = scmp.ne.s32.totalorder %s1064_s1, %s711_s26 }
  0x13   : > { %p718_p5 = scmp.lt.u32.totalorder %s711_s26, %s1064_s1 }
  0x14   : > { %p713_p13 = pneg %p914_p11 }
  0x16   : > { %p714_p0 = pnand %p713_p13, %p712_p12 }
  0x18   : > { %p715_p3 = pneg %p714_p0 }
  0x1a   : > { %p720_p7 = pnand %p718_p5, %p715_p3 }
  0x1c   : > { %723 = shalt.err (!%p720_p7)
}
  0x1d   : > { %s724_s3 = scalar_lea.vmem %s907_s19, 8192  ;;  %p732_p2 = scmp.lt.s32.totalorder %s907_s19, %s907_s19 }
  0x1e   : > { %p725_p9 = scmp.ne.s32.totalorder %s907_s19, %s724_s3  ;;  %p733_p6 = scmp.lt.s32.totalorder %s724_s3, %s724_s3 }
  0x20   : > { %p727_p10 = pnand %p725_p9, %p713_p13  ;;  %p734_p4 = por %p733_p6, %p732_p2 }
  0x22   : > { %p728_p1 = pneg %p727_p10 }
  0x24   : > { %p735_p8 = pnand %p734_p4, %p728_p1 }
  0x26   : > { %738 = shalt.err (!%p735_p8)
}
  0x27   : > { %s842_s4 = smov 128   ;;  %s843_s5 = smov 8  }
  0x28   : > { %660 = dma.hbm_to_vmem [thread:$0]  (!%p914_p11), %s1064_s1, 8192, %s907_s19, [#allocation6], %s842_s4, %s842_s4, %s843_s5  }
  0x29   : > { %p24_p2 = scmp.eq.s32.totalorder %s23_s23, 0  ;;  %p33_p1 = scmp.ne.s32.totalorder %s835_s11, %s831_s10 }
  0x2a   : > { %p34_p4 = scmp.eq.s32.totalorder %s839_s12, 0  ;;  %p670_p6 = scmp.lt.s32.totalorder %s839_s12, 2 }
  0x2b   : > { %s950_s8 = scalar_select %p24_p2, %s835_s11, %s26_s22  }
  0x2c   : > { %p35_p8 = por %p34_p4, %p33_p1  ;;  %p1073_p10 = scmp.eq.s32.totalorder %s884_s13, 1 }
  0x2d   : > { %s123_s18 = sand.u32 1, %s835_s11   ;;  %s514_s24 = sshll.u32 %s839_s12, 7 }
  0x2e   : > { %p954_p12 = por %p1073_p10, %p33_p1  ;;  %s503_s25 = sshll.u32 %s123_s18, 3 }
  0x2f   : > { %s963_s27 = scalar_lea.hbm %s1063_s0, %s514_s24  ;;  %s127_s19 = scalar_lea.vmem [#allocation2], %s503_s25 }
  0x30   : > { %s135_s22 = sshll.u32 %s127_s19, 4  ;;  %p965_p11 = pnand %p670_p6, %p35_p8  ;;  %s969_s22 = int_to_ptr.vmem [resolvable:$true] %s135_s22 }
  0x31   : > { %s124_s28 = scalar_lea.sflag [#allocation3], %s123_s18  ;;  %s739_s29 = scalar_lea.hbm %s963_s27, 128 }
  0x32   : > { %p740_p13 = scmp.ne.s32.totalorder %s963_s27, %s739_s29  ;;  %p741_p0 = pneg %p965_p11 }
  0x33   : > { %s744_s4 = scalar_lea.hbm %s1063_s0, 256  ;;  %p745_p7 = scmp.lt.u32.totalorder %s963_s27, %s1063_s0 }
  0x34   : > { %p742_p3 = pnand %p741_p0, %p740_p13  ;;  %p746_p9 = scmp.lt.u32.totalorder %s744_s4, %s739_s29 }
  0x35   : > { %p748_p1 = scmp.lt.u32.totalorder %s739_s29, %s963_s27 }
  0x36   : > { %p743_p5 = pneg %p742_p3  ;;  %p747_p2 = por %p746_p9, %p745_p7 }
  0x38   : > { %p749_p4 = por %p748_p1, %p747_p2 }
  0x3a   : > { %p750_p6 = pnand %p749_p4, %p743_p5 }
  0x3c   : > { %753 = shalt.err (!%p750_p6)
}
  0x3d   : > { %s754_s7 = scalar_lea.vmem %s969_s22, 128  ;;  %s844_s18 = smov [#allocation2]  }
  0x3e   : > { %p755_p8 = scmp.ne.s32.totalorder %s969_s22, %s754_s7  ;;  %s759_s24 = sshll.u32 %s844_s18, 4  ;;  %s760_s24 = int_to_ptr.vmem [resolvable:$false] %s759_s24 }
  0x3f   : > { %s761_s25 = scalar_lea.vmem %s760_s24, 256  ;;  %p762_p3 = scmp.lt.s32.totalorder %s969_s22, %s760_s24 }
  0x40   : > { %p757_p10 = pnand %p755_p8, %p741_p0  ;;  %p763_p7 = scmp.lt.s32.totalorder %s761_s25, %s754_s7 }
  0x42   : > { %p758_p13 = pneg %p757_p10  ;;  %p764_p9 = por %p763_p7, %p762_p3 }
  0x44   : > { %p765_p2 = pnand %p764_p9, %p758_p13 }
  0x46   : > { %768 = shalt.err (!%p765_p2)
}
  0x47   : > { %664 = dma.hbm_to_vmem [thread:$0]  (!%p965_p11), %s963_s27, 128, %s969_s22, %s124_s28  }
  0x48   : > { %p1076_p5 = scmp.ne.s32.totalorder %s1071_s17, 0 }
  0x49   : > { %s999_s20 = sand.u32 (!%p1076_p5), 1, %s831_s10   ;;  %p1077_p0 = scmp.ne.s32.totalorder (!%p1076_p5), %s1069_s15, 0 }
  0x4a   : > { %144 = sbr.rel (%p1076_p5) target bundleno = 353 (0x161), region = 28  ;;  %s507_s26 = sshll.u32 (!%p1076_p5), %s999_s20, 3 }
  0x4b   : > { %s147_s19 = scalar_lea.sflag (!%p1076_p5), [#allocation3], %s999_s20  ;;  %s1003_s29 = scalar_lea.vmem (!%p1076_p5), [#allocation2], %s507_s26 }
  0x51   : > { %814 = dma.done.wait (%p1077_p0), %s147_s19, 128  }
  0x52   : > { %816 = vsyncadd (%p1077_p0), %s147_s19, 4294967168  ;;  %p1078_p11 = scmp.eq.s32.totalorder %s884_s13, 0 }
  0x54   : > { %818 = dma.done.wait (%p1078_p11), [#allocation6], 8192   ;;  %p1079_p1 = pmov %p1078_p11 }
  0x55   : > { %v193_v0 = vld [vmem:[#allocation5 + $0x80] sm:$0xff]  ;;  %v194_v1 = vld [vmem:[#allocation5 + $0x88] sm:$0xff]  ;;  %v195_v11 = vld [vmem:[#allocation5 + $0x90] sm:$0xff]  ;;  %v845_v47 = vmov 1983009808   ;;  %v247_v49 = vlaneseq  ;;  %s509_s15 = sshll.u32 %s999_s20, 2 }
  0x56   : > { %820 = vsyncadd (%p1079_p1), [#allocation6], 4294959104  ;;  %v225_v2 = vld [vmem:[#allocation5 + $0x180] sm:$0xff]  ;;  %v585_v3 = vpack.c.bf16 %v194_v1, %v193_v0  ;;  %v226_v4 = vld [vmem:[#allocation5 + $0x188] sm:$0xff]  ;;  %v245_v48 = vunpack.c.l.s4 %v845_v47  ;;  %s174_s17 = scalar_lea.vmem [#allocation7], %s509_s15  ;;  %s511_s27 = sshll.u32 %s884_s13, 6 }
  0x57   : > { %v177_v5 = vld [vmem:[#allocation5] sm:$0xff]  ;;  %v178_v6 = vld [vmem:[#allocation5 + $0x8] sm:$0xff]  ;;  %v617_v7 = vpack.c.bf16 %v226_v4, %v225_v2  ;;  %v196_v13 = vld [vmem:[#allocation5 + $0x98] sm:$0xff]  ;;  %v248_v0 = vshrl.u32 %v247_v49, 7  ;;  %s419_s22 = sshll.u32 %s174_s17, 4  ;;  %s1019_s30 = scalar_lea.hbm %s1065_s2, %s511_s27  ;;  %s1021_s22 = int_to_ptr.vmem [resolvable:$true] %s419_s22 }
  0x58   : > { %v587_v8 = vpack.c.bf16 %v178_v6, %v177_v5  ;;  %v209_v9 = vld [vmem:[#allocation5 + $0x100] sm:$0xff]  ;;  %v210_v10 = vld [vmem:[#allocation5 + $0x108] sm:$0xff]  ;;  %586 = vmatprep.subr.bf16.mxu0 %v585_v3  ;;  %v227_v14 = vld [vmem:[#allocation5 + $0x190] sm:$0xff]  ;;  %v589_v16 = vpack.c.bf16 %v196_v13, %v195_v11  ;;  %v246_v63 = vunpack.c.0.s8 %v245_v48  ;;  %s406_s3 = scalar_lea.sflag [#allocation4], %s999_s20  ;;  %s769_s4 = scalar_lea.vmem %s1021_s22, 64 }
  0x59   : > { %v619_v12 = vpack.c.bf16 %v210_v10, %v209_v9  ;;  %v228_v15 = vld [vmem:[#allocation5 + $0x198] sm:$0xff]  ;;  %618 = vmatprep.subr.bf16.mxu1 %v617_v7  ;;  %v179_v18 = vld [vmem:[#allocation5 + $0x10] sm:$0xff]  ;;  %v197_v23 = vld [vmem:[#allocation5 + $0xa0] sm:$0xff]  ;;  %p770_p4 = scmp.ne.s32.totalorder %s1021_s22, %s769_s4  ;;  %s847_s13 = smov [#allocation7]  }
  0x5a   : > { %588 = vmatpush3.bf16.msra.mxu0 %v587_v8  ;;  %v621_v17 = vpack.c.bf16 %v228_v15, %v227_v14  ;;  %v180_v19 = vld [vmem:[#allocation5 + $0x18] sm:$0xff]  ;;  %v211_v20 = vld [vmem:[#allocation5 + $0x110] sm:$0xff]  ;;  %v198_v24 = vld [vmem:[#allocation5 + $0xa8] sm:$0xff]  ;;  %v249_v13 = vsub.s32 %v246_v63, %v248_v0  ;;  %s773_s5 = sshll.u32 %s847_s13, 4  ;;  %s774_s5 = int_to_ptr.vmem [resolvable:$false] %s773_s5 }
  0x5b   : > { %620 = vmatpush3.bf16.msra.mxu1 %v619_v12  ;;  %v591_v21 = vpack.c.bf16 %v180_v19, %v179_v18  ;;  %v212_v22 = vld [vmem:[#allocation5 + $0x118] sm:$0xff]  ;;  %590 = vmatprep.subr.bf16.mxu0 %v589_v16  ;;  %v593_v26 = vpack.c.bf16 %v198_v24, %v197_v23  ;;  %v229_v27 = vld [vmem:[#allocation5 + $0x1a0] sm:$0xff]  ;;  %v230_v28 = vld [vmem:[#allocation5 + $0x1a8] sm:$0xff]  ;;  %p771_p6 = pnand %p770_p4, %p954_p12  ;;  %s775_s6 = scalar_lea.vmem %s774_s5, 128 }
  0x5c   : > { %622 = vmatprep.subr.bf16.mxu1 %v621_v17  ;;  %v623_v25 = vpack.c.bf16 %v212_v22, %v211_v20  ;;  %v181_v29 = vld [vmem:[#allocation5 + $0x20] sm:$0xff]  ;;  %v625_v30 = vpack.c.bf16 %v230_v28, %v229_v27  ;;  %v182_v31 = vld [vmem:[#allocation5 + $0x28] sm:$0xff]  ;;  %v199_v35 = vld [vmem:[#allocation5 + $0xb0] sm:$0xff]  ;;  %p776_p10 = scmp.lt.s32.totalorder %s1021_s22, %s774_s5  ;;  %p777_p13 = scmp.lt.s32.totalorder %s775_s6, %s769_s4 }
  0x5d   : > { %v213_v32 = vld [vmem:[#allocation5 + $0x120] sm:$0xff]  ;;  %v214_v33 = vld [vmem:[#allocation5 + $0x128] sm:$0xff]  ;;  %v595_v34 = vpack.c.bf16 %v182_v31, %v181_v29  ;;  %v200_v36 = vld [vmem:[#allocation5 + $0xb8] sm:$0xff]  ;;  %p772_p8 = pneg %p771_p6 }
  0x5e   : > { %592 = vmatpush3.bf16.msra.mxu0 %v591_v21  ;;  %v231_v37 = vld [vmem:[#allocation5 + $0x1b0] sm:$0xff]  ;;  %v627_v38 = vpack.c.bf16 %v214_v33, %v213_v32  ;;  %v597_v39 = vpack.c.bf16 %v200_v36, %v199_v35  ;;  %v232_v40 = vld [vmem:[#allocation5 + $0x1b8] sm:$0xff]  ;;  %v201_v46 = vld [vmem:[#allocation5 + $0xc0] sm:$0xff]  ;;  %p778_p3 = por %p777_p13, %p776_p10 }
  0x5f   : > { %624 = vmatpush3.bf16.msra.mxu1 %v623_v25  ;;  %594 = vmatprep.subr.bf16.mxu0 %v593_v26  ;;  %v183_v41 = vld [vmem:[#allocation5 + $0x30] sm:$0xff]  ;;  %v184_v42 = vld [vmem:[#allocation5 + $0x38] sm:$0xff]  ;;  %v629_v43 = vpack.c.bf16 %v232_v40, %v231_v37  ;;  %v202_v50 = vld [vmem:[#allocation5 + $0xc8] sm:$0xff] }
  0x60   : > { %626 = vmatprep.subr.bf16.mxu1 %v625_v30  ;;  %v215_v44 = vld [vmem:[#allocation5 + $0x130] sm:$0xff]  ;;  %v216_v45 = vld [vmem:[#allocation5 + $0x138] sm:$0xff]  ;;  %v233_v51 = vld [vmem:[#allocation5 + $0x1c0] sm:$0xff]  ;;  %v599_v53 = vpack.c.bf16 %v184_v42, %v183_v41  ;;  %v601_v55 = vpack.c.bf16 %v202_v50, %v201_v46  ;;  %p779_p7 = pnand %p778_p3, %p772_p8 }
  0x61   : > { %v234_v52 = vld [vmem:[#allocation5 + $0x1c8] sm:$0xff]  ;;  %v631_v54 = vpack.c.bf16 %v216_v45, %v215_v44  ;;  %v185_v56 = vld [vmem:[#allocation5 + $0x40] sm:$0xff]  ;;  %v203_v61 = vld [vmem:[#allocation5 + $0xd0] sm:$0xff]  ;;  %v846_v44 = vmov 0.0  }
  0x62   : > { %596 = vmatpush3.bf16.msra.mxu0 %v595_v34  ;;  %v186_v57 = vld [vmem:[#allocation5 + $0x48] sm:$0xff]  ;;  %v217_v58 = vld [vmem:[#allocation5 + $0x140] sm:$0xff]  ;;  %v633_v59 = vpack.c.bf16 %v234_v52, %v233_v51  ;;  %v204_v62 = vld [vmem:[#allocation5 + $0xd8] sm:$0xff]  ;;  %175 = vst [vmem:[%s174_s17] sm:$0x1] %v846_v44 }
  0x63   : > { %628 = vmatpush3.bf16.msra.mxu1 %v627_v38  ;;  %598 = vmatprep.subr.bf16.mxu0 %v597_v39  ;;  %v218_v60 = vld [vmem:[#allocation5 + $0x148] sm:$0xff]  ;;  %v235_v1 = vld [vmem:[#allocation5 + $0x1d0] sm:$0xff]  ;;  %v236_v2 = vld [vmem:[#allocation5 + $0x1d8] sm:$0xff]  ;;  %v603_v3 = vpack.c.bf16 %v186_v57, %v185_v56  ;;  %v605_v5 = vpack.c.bf16 %v204_v62, %v203_v61  ;;  %176 = vst [vmem:[%s174_s17 + $0x3] sm:$0x1] %v846_v44 }
  0x64   : > { %630 = vmatprep.subr.bf16.mxu1 %v629_v43  ;;  %v635_v4 = vpack.c.bf16 %v218_v60, %v217_v58  ;;  %v187_v6 = vld [vmem:[#allocation5 + $0x50] sm:$0xff]  ;;  %v188_v7 = vld [vmem:[#allocation5 + $0x58] sm:$0xff]  ;;  %v637_v9 = vpack.c.bf16 %v236_v2, %v235_v1  ;;  %v205_v11 = vld [vmem:[#allocation5 + $0xe0] sm:$0xff] }
  0x65   : > { %v219_v8 = vld [vmem:[#allocation5 + $0x150] sm:$0xff]  ;;  %v220_v10 = vld [vmem:[#allocation5 + $0x158] sm:$0xff]  ;;  %v206_v12 = vld [vmem:[#allocation5 + $0xe8] sm:$0xff]  ;;  %v607_v16 = vpack.c.bf16 %v188_v7, %v187_v6 }
  0x66   : > { %600 = vmatpush3.bf16.msra.mxu0 %v599_v53  ;;  %v237_v14 = vld [vmem:[#allocation5 + $0x1e0] sm:$0xff]  ;;  %v238_v15 = vld [vmem:[#allocation5 + $0x1e8] sm:$0xff]  ;;  %v639_v18 = vpack.c.bf16 %v220_v10, %v219_v8  ;;  %v609_v19 = vpack.c.bf16 %v206_v12, %v205_v11  ;;  %v241_v22 = vld [vmem:[%s1003_s29] sm:$0xff] }
  0x67   : > { %632 = vmatpush3.bf16.msra.mxu1 %v631_v54  ;;  %602 = vmatprep.subr.bf16.mxu0 %v601_v55  ;;  %v189_v17 = vld [vmem:[#allocation5 + $0x60] sm:$0xff]  ;;  %v190_v20 = vld [vmem:[#allocation5 + $0x68] sm:$0xff]  ;;  %v641_v23 = vpack.c.bf16 %v238_v15, %v237_v14  ;;  %v207_v25 = vld [vmem:[#allocation5 + $0xf0] sm:$0xff]  ;;  %v250_v27 = vrot.slane %v241_v22, %v249_v13  ;;  %v243_v28 = vcombine.high %v241_v22, %v241_v22 }
  0x68   : > { %634 = vmatprep.subr.bf16.mxu1 %v633_v59  ;;  %v221_v21 = vld [vmem:[#allocation5 + $0x160] sm:$0xff]  ;;  %v222_v24 = vld [vmem:[#allocation5 + $0x168] sm:$0xff]  ;;  %v208_v26 = vld [vmem:[#allocation5 + $0xf8] sm:$0xff]  ;;  %v611_v31 = vpack.c.bf16 %v190_v20, %v189_v17 }
  0x69   : > { %v239_v29 = vld [vmem:[#allocation5 + $0x1f0] sm:$0xff]  ;;  %v240_v30 = vld [vmem:[#allocation5 + $0x1f8] sm:$0xff]  ;;  %v258_v32 = vcombine.high %v250_v27, %v250_v27  ;;  %v257_v33 = vrot.slane %v243_v28, %v249_v13  ;;  %v643_v34 = vpack.c.bf16 %v222_v24, %v221_v21  ;;  %v613_v35 = vpack.c.bf16 %v208_v26, %v207_v25 }
  0x6a   : > { %604 = vmatpush3.bf16.msra.mxu0 %v603_v3  ;;  %v191_v36 = vld [vmem:[#allocation5 + $0x70] sm:$0xff]  ;;  %v192_v37 = vld [vmem:[#allocation5 + $0x78] sm:$0xff]  ;;  %v645_v38 = vpack.c.bf16 %v240_v30, %v239_v29 }
  0x6b   : > { %636 = vmatpush3.bf16.msra.mxu1 %v635_v4  ;;  %606 = vmatprep.subr.bf16.mxu0 %v605_v5  ;;  %v223_v39 = vld [vmem:[#allocation5 + $0x170] sm:$0xff]  ;;  %v224_v40 = vld [vmem:[#allocation5 + $0x178] sm:$0xff]  ;;  %v259_v41 = vcombine.high %v257_v33, %v257_v33  ;;  %v615_v42 = vpack.c.bf16 %v192_v37, %v191_v36 }
  0x6c   : > { %638 = vmatprep.subr.bf16.mxu1 %v637_v9  ;;  %328 = vmatprep.mubr.f32.mxu0 %v258_v32  ;;  %v647_v43 = vpack.c.bf16 %v224_v40, %v223_v39 }
  0x6d   : > { %398 = vmatprep.mubr.f32.mxu1 %v259_v41 }
  0x6e   : > { %608 = vmatpush3.bf16.msra.mxu0 %v607_v16 }
  0x6f   : > { %640 = vmatpush3.bf16.msra.mxu1 %v639_v18  ;;  %610 = vmatprep.subr.bf16.mxu0 %v609_v19 }
  0x70   : > { %642 = vmatprep.subr.bf16.mxu1 %v641_v23 }
  0x72   : > { %612 = vmatpush3.bf16.msra.mxu0 %v611_v31 }
  0x73   : > { %644 = vmatpush3.bf16.msra.mxu1 %v643_v34  ;;  %614 = vmatprep.subr.bf16.mxu0 %v613_v35 }
  0x74   : > { %646 = vmatprep.subr.bf16.mxu1 %v645_v38 }
  0x76   : > { %616 = vmatpush3.bf16.msra.mxu0 %v615_v42 }
  0x77   : > { %648 = vmatpush3.bf16.msra.mxu1 %v647_v43 }
  0x79   : > { %329 = vmatmul.mubr.f32.vlgmr.msra.gmra.mrb[0].mxu0 %v250_v27 }
  0x7a   : > { %399 = vmatmul.mubr.f32.vlgmr.msra.gmra.mrb[0].mxu1 %v257_v33 }
 0x14c   : > { %v547_v45 = vpop.f32.mrb[0].mxu0 }
 0x14d   : > { %v582_v46 = vpop.f32.mrb[0].mxu1  ;;  %v548_v47 = vpop.f32.mrb[1].mxu0 }
 0x14e   : > { %v549_v48 = vadd.f32 %v548_v47, %v547_v45  ;;  %v583_v49 = vpop.f32.mrb[1].mxu1 }
 0x14f   : > { %v584_v50 = vadd.f32 %v583_v49, %v582_v46 }
 0x151   : > { %v401_v51 = vadd.f32 %v584_v50, %v549_v48 }
 0x153   : > { %404 = vst [vmem:[%s174_s17 + $0x1] sm:$0x3] %v401_v51 }
 0x154   : > { %782 = shalt.err (!%p779_p7)
}
 0x155   : > { %s783_s7 = scalar_lea.hbm %s1019_s30, 64  ;;  %s787_s25 = scalar_lea.hbm %s1065_s2, 128 }
 0x156   : > { %p784_p9 = scmp.ne.s32.totalorder %s1019_s30, %s783_s7  ;;  %p788_p0 = scmp.lt.u32.totalorder %s1019_s30, %s1065_s2 }
 0x157   : > { %p789_p11 = scmp.lt.u32.totalorder %s787_s25, %s783_s7  ;;  %p791_p4 = scmp.lt.u32.totalorder %s783_s7, %s1019_s30 }
 0x158   : > { %p785_p2 = pnand %p784_p9, %p954_p12 }
 0x159   : > { %p790_p1 = por %p789_p11, %p788_p0 }
 0x15a   : > { %p786_p5 = pneg %p785_p2 }
 0x15b   : > { %p792_p6 = por %p791_p4, %p790_p1 }
 0x15d   : > { %p793_p8 = pnand %p792_p6, %p786_p5 }
 0x15f   : > { %796 = shalt.err (!%p793_p8)
}
 0x160   : > { %655 = dma.vmem_to_hbm [thread:$0]  (%p954_p12), %s1021_s22, 64, %s1019_s30, %s406_s3  }
 0x161 PF: > { %s431_s19 = sand.u32 1, %s827_s9   ;;  %p1080_p10 = scmp.ne.s32.totalorder %s1070_s16, 0 }
 0x162   : > { %p1081_p13 = scmp.ge.s32.totalorder %s839_s12, 2  ;;  %s432_s29 = scalar_lea.sflag [#allocation4], %s431_s19 }
 0x164   : > { %p666_p3 = pnand %p1081_p13, %p1080_p10 }
 0x166   : > { %822 = dma.done.wait (!%p666_p3), %s432_s29, 64  }
 0x167   : > { %824 = vsyncadd (!%p666_p3), %s432_s29, 4294967232  ;;  %p16_p7 = scmp.ge.s32.totalorder %s919_s21, 4   ;;  %s1082_s9 = smov %s831_s10 }
 0x168   : > { %s1083_s10 = smov %s835_s11  ;;  %s1084_s11 = smov %s950_s8 }
 0x169   : > { %s1085_s12 = smov %s919_s21  ;;  %18 = sbr.rel (!%p16_p7) target bundleno = 6 (0x6), region = 77 }
 0x170   :  { %437 = vsyncpa [#allocation3], 1 }
 0x171   :  { %439 = vsyncpa [#allocation3 + $0x1], 1 }
 0x172   :  { %440 = vsyncpa [#allocation6], 1 }
 0x173   :  { %441 = vsyncpa [#allocation4], 1 }
 0x174   :  { %443 = vsyncpa [#allocation4 + $0x1], 1 }

</bundles_post_ra>
